<compile_context>
chip_gen: v7x
topology: tpu7x:2x2x1
jax: 0.10.0
libtpu: 0.0.40
codegen_flags: <defaults>
</compile_context>

<pallas_src>
import functools

import jax
import jax.numpy as jnp
from jax.experimental import pallas as pl
from jax.experimental.pallas import tpu as pltpu


def _round_up(x: int, m: int) -> int:
    return (x + m - 1) // m * m


def _slp_kernel(x_ref, w_ref, o_ref):
    # x_ref: (bm, bk) bf16 tile of the batch          (K in lanes)
    # w_ref: (bk, bn) bf16 tile of the (K, N) weight  (N in lanes -> no XLU
    #        relayout before the MXU weight push)
    # o_ref: (bm, bn) f32 output tile, resident across the K grid axis; it is
    #        the accumulator (no extra VMEM scratch, no finalize copy).
    @pl.when(pl.program_id(2) == 0)
    def _():
        o_ref[...] = jnp.zeros_like(o_ref)

    o_ref[...] += jnp.dot(
        x_ref[...], w_ref[...], preferred_element_type=jnp.float32
    )


def prepare_weight(weight, *, block_n=256, block_k=1024,
                   compute_dtype=jnp.bfloat16):
    """One-time packing of the PyTorch-layout weight.

    weight: (output_size, input_size) = (N, K), any float dtype.
    Returns the weight transposed to (Kp, Np) (K in sublanes, N in lanes),
    zero-padded to tile multiples and cast to the MXU compute dtype.
    Call this once at parameter-setup time, NOT per forward call.
    """
    N, K = weight.shape
    bn = min(block_n, _round_up(N, 128))
    bk = min(block_k, _round_up(K, 128))
    Np = _round_up(N, bn)
    Kp = _round_up(K, bk)
    w_kn = weight.T  # (K, N)
    if (Kp, Np) != (K, N):
        w_kn = jnp.pad(w_kn, ((0, Kp - K), (0, Np - N)))
    return jnp.asarray(w_kn, dtype=compute_dtype)


@functools.partial(
    jax.jit,
    static_argnames=("out_features", "block_m", "block_n", "block_k"),
)
def slpnet_forward(x, w_kn, *, out_features,
                   block_m=512, block_n=256, block_k=1024):
    """Forward pass of SLPNet: x @ weight.T (no bias), f32 output.

    x:    (B, input_size) float
    w_kn: pre-packed weight from prepare_weight(), shape (Kp, Np)
    out_features: original output_size (to slice off N padding)
    """
    B, K = x.shape
    Kp, Np = w_kn.shape
    assert K <= Kp, "x feature dim exceeds packed weight K"

    compute_dtype = w_kn.dtype
    # Sublane packing is dtype dependent: bf16 packs 16 rows per vreg, f32 8.
    sub = 16 if compute_dtype == jnp.bfloat16 else 8

    # Single M tile for inference-sized batches (B <= block_m): the weight
    # then streams from HBM exactly once. Tile sizes derived from the packed
    # weight shape so they match prepare_weight's padding.
    bm = min(block_m, _round_up(B, sub))
    bn = min(block_n, Np)
    bk = min(block_k, Kp)

    Bp = _round_up(B, bm)

    x = x.astype(compute_dtype)
    if (Bp, Kp) != (B, K):
        # Zero padding in K contributes nothing to the dot; padded M rows are
        # sliced off below. Skipped entirely when already aligned.
        x = jnp.pad(x, ((0, Bp - B), (0, Kp - K)))

    grid = (Bp // bm, Np // bn, Kp // bk)

    bytes_in = (Bp * Kp + Kp * Np) * jnp.dtype(compute_dtype).itemsize
    bytes_out = Bp * Np * 4

    out_padded = pl.pallas_call(
        _slp_kernel,
        out_shape=jax.ShapeDtypeStruct((Bp, Np), jnp.float32),
        grid_spec=pltpu.PrefetchScalarGridSpec(
            num_scalar_prefetch=0,
            grid=grid,
            in_specs=[
                pl.BlockSpec((bm, bk), lambda i, j, k: (i, k)),  # x tile
                pl.BlockSpec((bk, bn), lambda i, j, k: (k, j)),  # W tile (K,N)
            ],
            out_specs=pl.BlockSpec((bm, bn), lambda i, j, k: (i, j)),
        ),
        compiler_params=pltpu.CompilerParams(
            dimension_semantics=("parallel", "parallel", "arbitrary"),
        ),
        cost_estimate=pl.CostEstimate(
            flops=2 * Bp * Np * Kp,
            transcendentals=0,
            bytes_accessed=bytes_in + bytes_out,
        ),
    )(x, w_kn)

    if (Bp, Np) != (B, out_features):
        out_padded = out_padded[:B, :out_features]
    return out_padded


if __name__ == "__main__":
    # Small shapes consistent with the module's forward: a batch of feature
    # vectors through a bias-free Linear layer.
    batch = 8
    input_size = 32
    output_size = 4

    key = jax.random.PRNGKey(0)
    kx, kw = jax.random.split(key)

    x = jax.random.normal(kx, (batch, input_size), dtype=jnp.float32)
    # nn.init.normal_(self.fc.weight, 0.0, 1.0) -> standard normal weights.
    weight = jax.random.normal(kw, (output_size, input_size), dtype=jnp.float32)

    # One-time parameter packing (outside the per-call forward).
    w_kn = prepare_weight(weight)

    out = slpnet_forward(x, w_kn, out_features=output_size)
    out = jax.block_until_ready(out)

    assert out.shape == (batch, output_size)

    # Reference with the same numerics as the kernel path (bf16 in, f32 acc).
    ref_bf16 = jnp.dot(
        x.astype(jnp.bfloat16),
        weight.T.astype(jnp.bfloat16),
        preferred_element_type=jnp.float32,
    )
    assert jnp.allclose(out, ref_bf16, atol=1e-3, rtol=1e-3)

    # Loose check against the full-f32 PyTorch-equivalent reference.
    ref_f32 = x @ weight.T
    assert jnp.allclose(out, ref_f32, atol=1e-1, rtol=5e-2)

    print("KERNEL_OK")
</pallas_src>

<mosaic_0001>
module attributes {stable_mosaic.version = 11 : i64} {
  func.func @_slp_kernel(%arg0: i32, %arg1: i32, %arg2: i32, %arg3: memref<16x128xbf16, #tpu.memory_space<vmem>>, %arg4: memref<128x128xbf16, #tpu.memory_space<vmem>>, %arg5: memref<16x128xf32, #tpu.memory_space<vmem>>) attributes {dimension_semantics = [#tpu.dimension_semantics<parallel>, #tpu.dimension_semantics<parallel>, #tpu.dimension_semantics<arbitrary>], iteration_bounds = array<i64: 1, 1, 1>, scalar_prefetch = 0 : i64, scratch_operands = 0 : i64, tpu.core_type = #tpu.core_type<tc>, window_params = [{transform_indices = @transform_0, window_bounds = array<i64: 16, 128>}, {transform_indices = @transform_1, window_bounds = array<i64: 128, 128>}, {transform_indices = @transform_2, window_bounds = array<i64: 16, 128>}]} {
    %c0_i32 = arith.constant 0 : i32
    %0 = arith.cmpi eq, %arg2, %c0_i32 : i32
    %1 = arith.extui %0 : i1 to i32
    %c0_i32_0 = arith.constant 0 : i32
    %2 = arith.cmpi ne, %1, %c0_i32_0 : i32
    scf.if %2 {
      %cst_8 = arith.constant 0.000000e+00 : f32
      %9 = vector.broadcast %cst_8 : f32 to vector<16x128xf32>
      %c0_9 = arith.constant 0 : index
      %c0_10 = arith.constant 0 : index
      %10 = vector.load %arg5[%c0_9, %c0_10] : memref<16x128xf32, #tpu.memory_space<vmem>>, vector<16x128xf32>
      tpu.vector_store %arg5[%c0_9, %c0_10], %9 {strides = array<i32>} : memref<16x128xf32, #tpu.memory_space<vmem>>, vector<16x128xf32>,
    } else {
    }
    %c0 = arith.constant 0 : index
    %c0_1 = arith.constant 0 : index
    %3 = vector.load %arg5[%c0, %c0_1] : memref<16x128xf32, #tpu.memory_space<vmem>>, vector<16x128xf32>
    %c0_2 = arith.constant 0 : index
    %c0_3 = arith.constant 0 : index
    %4 = vector.load %arg3[%c0_2, %c0_3] : memref<16x128xbf16, #tpu.memory_space<vmem>>, vector<16x128xbf16>
    %c0_4 = arith.constant 0 : index
    %c0_5 = arith.constant 0 : index
    %5 = vector.load %arg4[%c0_4, %c0_5] : memref<128x128xbf16, #tpu.memory_space<vmem>>, vector<128x128xbf16>
    %cst = arith.constant dense<0.000000e+00> : vector<16x128xf32>
    %6 = tpu.matmul %4, %5, %cst {dimension_numbers = #tpu.dot_dimension_numbers<[1], [0], [0], [1], [0, 0, 1, 1], [], []>} : vector<16x128xbf16>, vector<128x128xbf16>, vector<16x128xf32> -> vector<16x128xf32>
    %7 = arith.addf %3, %6 : vector<16x128xf32>
    %c0_6 = arith.constant 0 : index
    %c0_7 = arith.constant 0 : index
    %8 = vector.load %arg5[%c0_6, %c0_7] : memref<16x128xf32, #tpu.memory_space<vmem>>, vector<16x128xf32>
    tpu.vector_store %arg5[%c0_6, %c0_7], %7 {strides = array<i32>} : memref<16x128xf32, #tpu.memory_space<vmem>>, vector<16x128xf32>,
    return
  }
  func.func @transform_0(%arg0: i32, %arg1: i32, %arg2: i32) -> (i32, i32) {
    %c0_i32 = arith.constant 0 : i32
    return %arg0, %arg2 : i32, i32
  }
  func.func @transform_1(%arg0: i32, %arg1: i32, %arg2: i32) -> (i32, i32) {
    %c0_i32 = arith.constant 0 : i32
    return %arg2, %arg1 : i32, i32
  }
  func.func @transform_2(%arg0: i32, %arg1: i32, %arg2: i32) -> (i32, i32) {
    %c0_i32 = arith.constant 0 : i32
    return %arg0, %arg1 : i32, i32
  }
}

</mosaic_0001>

<bundles_post_ra>
// kernel: slpnet_forward.1
= control target key start
LH: loop header
LB: loop body
LE: loop exit
PB: predicated region body
PF: predicated region fallthrough
CT: control target
= control target key end

     0   :  { %7 = vsyncpa [#allocation3], 0  ;;  %s232_s9 = smov [#allocation2]   ;;  %s273_s0 = inlined_call_operand.vmem [shape: bf16[16,128], index: 0, kind: input, shape index: {}]   ;;  %s274_s1 = inlined_call_operand.hbm [shape: bf16[128,128], index: 1, kind: input, shape index: {}]   ;;  %s275_s2 = inlined_call_operand.vmem [shape: f32[16,128], index: 2, kind: output, shape index: {}]  }
   0x1   :  { %s15_s10 = sshll.u32 %s232_s9, 4  ;;  %s208_s13 = scalar_lea.hbm %s274_s1, 1024  ;;  %s16_s10 = int_to_ptr.vmem [resolvable:$true] %s15_s10 }
   0x2   :  { %p209_p0 = scmp.ne.s32.totalorder %s274_s1, %s208_s13  ;;  %p212_p1 = scmp.lt.u32.totalorder %s208_s13, %s274_s1 }
   0x4   :  { %p214_p2 = pnand %p212_p1, %p209_p0 }
   0x6   :  { %217 = shalt.err (!%p214_p2)
}
   0x7   :  { %s218_s18 = scalar_lea.vmem %s16_s10, 1024  ;;  %p223_p4 = scmp.lt.s32.totalorder %s16_s10, %s16_s10 }
   0x8   :  { %p219_p3 = scmp.ne.s32.totalorder %s16_s10, %s218_s18  ;;  %p224_p5 = scmp.lt.s32.totalorder %s218_s18, %s218_s18 }
   0xa   :  { %p225_p6 = por %p224_p5, %p223_p4 }
   0xc   :  { %p226_p7 = pnand %p225_p6, %p219_p3 }
   0xe   :  { %229 = shalt.err (!%p226_p7)
}
   0xf   :  { %s233_s19 = smov 64   ;;  %s234_s20 = smov 4  }
  0x10   :  { %21 = dma.hbm_to_vmem [thread:$0]  %s274_s1, 1024, %s16_s10, [#allocation3], %s233_s19, %s233_s19, %s234_s20  }
  0x11   :  { %230 = dma.done.wait [#allocation3], 1024  }
  0x12   :  { %231 = vsyncadd [#allocation3], 4294966272  ;;  %v235_v0 = vmov 0.0   ;;  %vm236_vm0 = vmmov 0   ;;  %v199_v1 = vld [vmem:[#allocation2] sm:$0xff]   ;;  %v200_v2 = vld [vmem:[#allocation2 + $0x8] sm:$0xff]  }
  0x13   :  { %174 = vmatprep.subr.bf16.mxu0 %v235_v0  ;;  %190 = vmatprep.mubr.msk.bf16.mxu0 %vm236_vm0, %v235_v0  ;;  %v201_v3 = vld [vmem:[#allocation2 + $0x10] sm:$0xff]   ;;  %v202_v4 = vld [vmem:[#allocation2 + $0x18] sm:$0xff]   ;;  %v203_v5 = vld [vmem:[#allocation2 + $0x20] sm:$0xff]  }
  0x14   :  { %175 = vmatpush3.bf16.msra.mxu0 %v199_v1  ;;  %v204_v6 = vld [vmem:[#allocation2 + $0x28] sm:$0xff]   ;;  %v205_v7 = vld [vmem:[#allocation2 + $0x30] sm:$0xff]   ;;  %v206_v8 = vld [vmem:[#allocation2 + $0x38] sm:$0xff]  }
  0x15   :  { %176 = vmatprep.subr.bf16.mxu0 %v235_v0  ;;  %v207_v9 = vld [vmem:[%s273_s0] sm:$0xff]  }
  0x18   :  { %177 = vmatpush3.bf16.msra.mxu0 %v200_v2 }
  0x19   :  { %178 = vmatprep.subr.bf16.mxu0 %v235_v0 }
  0x1c   :  { %179 = vmatpush3.bf16.msra.mxu0 %v201_v3 }
  0x1d   :  { %180 = vmatprep.subr.bf16.mxu0 %v235_v0 }
  0x20   :  { %181 = vmatpush3.bf16.msra.mxu0 %v202_v4 }
  0x21   :  { %182 = vmatprep.subr.bf16.mxu0 %v235_v0 }
  0x24   :  { %183 = vmatpush3.bf16.msra.mxu0 %v203_v5 }
  0x25   :  { %184 = vmatprep.subr.bf16.mxu0 %v235_v0 }
  0x28   :  { %185 = vmatpush3.bf16.msra.mxu0 %v204_v6 }
  0x29   :  { %186 = vmatprep.subr.bf16.mxu0 %v235_v0 }
  0x2c   :  { %187 = vmatpush3.bf16.msra.mxu0 %v205_v7 }
  0x2d   :  { %188 = vmatprep.subr.bf16.mxu0 %v235_v0 }
  0x30   :  { %189 = vmatpush3.bf16.msra.mxu0 %v206_v8 }
  0x33   :  { %191 = vmatmul.mubr.bf16.vlgmr.msra.gmra.mrb[0].mxu0 %v207_v9 }
 0x106   :  { %v140_v10 = vpop.f32.mrb[0].mxu0 }
 0x107   :  { %v192_v11 = vpop.f32.mrb[1].mxu0  ;;  %149 = vst [vmem:[%s275_s2] sm:$0xff] %v140_v10 }
 0x108   :  { %v143_v12 = vpop.f32.mrb[2].mxu0 }
 0x109   :  { %v193_v13 = vpop.f32.mrb[3].mxu0  ;;  %150 = vst [vmem:[%s275_s2 + $0x8] sm:$0xff] %v143_v12 }
 0x10a   :  { %155 = vsyncpa [#allocation3], 1 }

</bundles_post_ra>
